<compile_context>
chip_gen: v6e
topology: v6e:2x2x1
jax: 0.10.0
libtpu: 0.0.40
codegen_flags: <defaults>
</compile_context>

<pallas_src>
import jax
import jax.numpy as jnp
from jax.experimental import pallas as pl
from jax.experimental.pallas import tpu as pltpu

_ROW_ALIGN = 16   # bf16 packs 16 rows per vreg -> keep batch tiles 16-aligned


def _round_up(x, m):
    return (x + m - 1) // m * m


def _mlp_kernel(x_ref, w1_ref, b1_ref, w2_ref, b2_ref, o_ref):
    # hidden = relu(x @ W1 + b1): MXU matmul in the weight dtype, f32 accumulation.
    x = x_ref[...].astype(w1_ref.dtype)
    h = jnp.dot(x, w1_ref[...], preferred_element_type=jnp.float32)
    h = jnp.maximum(h + b1_ref[...], 0.0)             # f32 bias + ReLU on the VPU
    # out = hidden @ W2 + b2: second MXU pass, f32 epilogue, store at true D_out.
    o = jnp.dot(h.astype(w2_ref.dtype), w2_ref[...],
                preferred_element_type=jnp.float32)
    o_ref[...] = (o + b2_ref[...]).astype(o_ref.dtype)


def _vmem_capacity_bytes():
    try:
        return int(pltpu.get_tpu_info().vmem_capacity_bytes)
    except Exception:
        return 64 * 1024 * 1024   # conservative: v7x per-TensorCore VMEM


def ann_regressor_forward(x, w1, b1, w2, b2, *, block_b=1024,
                          matmul_dtype=jnp.bfloat16, out_dtype=jnp.float32):
    """Fused forward: relu(x @ w1.T + b1) @ w2.T + b2.

    Weights in PyTorch nn.Linear layout:
      x : (B, D_in)   w1 : (H, D_in)   b1 : (H,)   w2 : (D_out, H)   b2 : (D_out,)
    Returns (B, D_out) in out_dtype (float32 by default, matching torch).
    Pass matmul_dtype=jnp.float32 for closer f32 parity with the torch forward.
    """
    B, D_in = x.shape
    H = w1.shape[0]
    D_out = w2.shape[0]

    # Weights/biases: transpose + cast once in the wrapper (one tiny HBM pass
    # over the weights only -- the big x stream is consumed untouched).
    w1_t = w1.T.astype(matmul_dtype)                 # (D_in, H)
    w2_t = w2.T.astype(matmul_dtype)                 # (H, D_out)
    b1_r = b1.reshape(1, H).astype(jnp.float32)
    b2_r = b2.reshape(1, D_out).astype(jnp.float32)

    itemsize_w = jnp.dtype(matmul_dtype).itemsize
    itemsize_x = x.dtype.itemsize
    itemsize_o = jnp.dtype(out_dtype).itemsize

    # --- VMEM working-set model -------------------------------------------
    weight_bytes = (D_in * H + H * D_out) * itemsize_w + (H + D_out) * 4
    # per batch-row: double-buffered x/out tiles + in-kernel temporaries
    # (bf16 copy of x, f32 + bf16 hidden activations, f32 output accumulator).
    row_bytes = (2 * D_in * itemsize_x + 2 * D_out * itemsize_o
                 + D_in * itemsize_w + H * (4 + itemsize_w) + D_out * 4)

    vmem_cap = _vmem_capacity_bytes()
    budget = (vmem_cap * 3) // 4                     # headroom for compiler temps
    plan = budget // 2                               # plan to use <= half the budget
    # Size the batch tile so it fits even if weights end up double-buffered.
    tb_vmem = max(((plan - 2 * weight_bytes) // max(row_bytes, 1))
                  // _ROW_ALIGN * _ROW_ALIGN, _ROW_ALIGN)
    # TODO(synk): layers whose weights alone exceed VMEM need a K-reduction grid
    # axis with a VMEM f32 accumulator (P3); resident weights cover hidden_units
    # up to several thousand here, which includes the module default of 512.

    # --- batch tiling -------------------------------------------------------
    tb = _round_up(max(min(block_b, B), 1), _ROW_ALIGN)
    if B > 2 * _ROW_ALIGN:
        # keep >= 2 batch tiles so both v7x TensorCores get work
        tb = min(tb, _round_up(pl.cdiv(B, 2), _ROW_ALIGN))
    tb = max(min(tb, tb_vmem), _ROW_ALIGN)
    grid_b = pl.cdiv(B, tb)                          # partial last tile is masked

    working_set = 2 * weight_bytes + tb * row_bytes
    vmem_limit = int(min(budget, max(2 * working_set, 32 * 1024 * 1024)))

    flops = 2 * B * (D_in * H + H * D_out)
    bytes_accessed = (B * D_in * itemsize_x
                      + (D_in * H + H * D_out) * itemsize_w + (H + D_out) * 4
                      + B * D_out * itemsize_o)

    def _call(single_buffer_resident):
        # Resident (constant-index) operands: single-buffer to halve their VMEM.
        resident_kw = (dict(pipeline_mode=pl.Buffered(1))
                       if single_buffer_resident else {})
        in_specs = [
            pl.BlockSpec((tb, D_in), lambda i: (i, 0)),                  # x tiles
            pl.BlockSpec((D_in, H), lambda i: (0, 0), **resident_kw),    # W1
            pl.BlockSpec((1, H), lambda i: (0, 0), **resident_kw),       # b1
            pl.BlockSpec((H, D_out), lambda i: (0, 0), **resident_kw),   # W2
            pl.BlockSpec((1, D_out), lambda i: (0, 0), **resident_kw),   # b2
        ]
        return pl.pallas_call(
            _mlp_kernel,
            out_shape=jax.ShapeDtypeStruct((B, D_out), out_dtype),
            grid=(grid_b,),
            in_specs=in_specs,
            out_specs=pl.BlockSpec((tb, D_out), lambda i: (i, 0)),
            compiler_params=pltpu.CompilerParams(
                # Independent batch tiles -> megacore sharding; drop to
                # "arbitrary" when the grid collapses to a single tile.
                dimension_semantics=("parallel",) if grid_b > 1 else ("arbitrary",),
                vmem_limit_bytes=vmem_limit,
            ),
            cost_estimate=pl.CostEstimate(
                flops=flops, transcendentals=0, bytes_accessed=bytes_accessed),
        )(x, w1_t, b1_r, w2_t, b2_r)

    try:
        return _call(True)
    except Exception:
        # pl.Buffered(1) not accepted by this JAX build -> default double buffering.
        return _call(False)


def init_params(key, input_dim, output_dim, hidden_units):
    """Deterministic init mirroring torch.nn.Linear parameter shapes:
    weight (out_features, in_features), bias (out_features,)."""
    k1, k2, k3, k4 = jax.random.split(key, 4)
    bound1 = 1.0 / float(input_dim) ** 0.5
    bound2 = 1.0 / float(hidden_units) ** 0.5
    w1 = jax.random.uniform(k1, (hidden_units, input_dim), jnp.float32,
                            -bound1, bound1)
    b1 = jax.random.uniform(k2, (hidden_units,), jnp.float32, -bound1, bound1)
    w2 = jax.random.uniform(k3, (output_dim, hidden_units), jnp.float32,
                            -bound2, bound2)
    b2 = jax.random.uniform(k4, (output_dim,), jnp.float32, -bound2, bound2)
    return w1, b1, w2, b2


if __name__ == "__main__":
    # Small shapes consistent with the module's forward.
    batch, input_dim, hidden_units, output_dim = 16, 8, 128, 4

    key = jax.random.PRNGKey(0)
    kx, kp = jax.random.split(key)
    x = jax.random.normal(kx, (batch, input_dim), jnp.float32)
    w1, b1, w2, b2 = init_params(kp, input_dim, output_dim, hidden_units)

    out = ann_regressor_forward(x, w1, b1, w2, b2)
    out = jax.block_until_ready(out)

    # Pure-JAX f32 reference of the PyTorch forward:
    # relu(x @ W1.T + b1) @ W2.T + b2
    ref = jnp.maximum(x @ w1.T + b1, 0.0) @ w2.T + b2
    assert out.shape == (batch, output_dim)
    # bf16 MXU operands (f32 accumulation) => loose tolerance vs f32 reference.
    assert jnp.allclose(out, ref, atol=5e-2, rtol=5e-2), "mismatch vs reference"

    print("KERNEL_OK")
</pallas_src>

<mosaic_0001>
module attributes {stable_mosaic.version = 11 : i64} {
  func.func @_mlp_kernel(%arg0: i32, %arg1: memref<16x8xf32, #tpu.memory_space<vmem>>, %arg2: memref<8x128xbf16, #tpu.memory_space<vmem>>, %arg3: memref<1x128xf32, #tpu.memory_space<vmem>>, %arg4: memref<128x4xbf16, #tpu.memory_space<vmem>>, %arg5: memref<1x4xf32, #tpu.memory_space<vmem>>, %arg6: memref<16x4xf32, #tpu.memory_space<vmem>>) attributes {dimension_semantics = [#tpu.dimension_semantics<arbitrary>], iteration_bounds = array<i64: 1>, scalar_prefetch = 0 : i64, scratch_operands = 0 : i64, tpu.core_type = #tpu.core_type<tc>, window_params = [{transform_indices = @transform_0, window_bounds = array<i64: 16, 8>}, {pipeline_mode = #tpu.pipeline_mode<synchronous>, transform_indices = @transform_1, window_bounds = array<i64: 8, 128>}, {pipeline_mode = #tpu.pipeline_mode<synchronous>, transform_indices = @transform_2, window_bounds = array<i64: 1, 128>}, {pipeline_mode = #tpu.pipeline_mode<synchronous>, transform_indices = @transform_3, window_bounds = array<i64: 128, 4>}, {pipeline_mode = #tpu.pipeline_mode<synchronous>, transform_indices = @transform_4, window_bounds = array<i64: 1, 4>}, {transform_indices = @transform_5, window_bounds = array<i64: 16, 4>}]} {
    %c0 = arith.constant 0 : index
    %c0_0 = arith.constant 0 : index
    %0 = vector.load %arg1[%c0, %c0_0] : memref<16x8xf32, #tpu.memory_space<vmem>>, vector<16x8xf32>
    %1 = arith.truncf %0 : vector<16x8xf32> to vector<16x8xbf16>
    %c0_1 = arith.constant 0 : index
    %c0_2 = arith.constant 0 : index
    %2 = vector.load %arg2[%c0_1, %c0_2] : memref<8x128xbf16, #tpu.memory_space<vmem>>, vector<8x128xbf16>
    %cst = arith.constant dense<0.000000e+00> : vector<16x128xf32>
    %3 = tpu.matmul %1, %2, %cst {dimension_numbers = #tpu.dot_dimension_numbers<[1], [0], [0], [1], [0, 0, 1, 1], [], []>} : vector<16x8xbf16>, vector<8x128xbf16>, vector<16x128xf32> -> vector<16x128xf32>
    %c0_3 = arith.constant 0 : index
    %c0_4 = arith.constant 0 : index
    %4 = vector.load %arg3[%c0_3, %c0_4] : memref<1x128xf32, #tpu.memory_space<vmem>>, vector<1x128xf32>
    %5 = vector.broadcast %4 : vector<1x128xf32> to vector<16x128xf32>
    %6 = arith.addf %3, %5 : vector<16x128xf32>
    %cst_5 = arith.constant 0.000000e+00 : f32
    %7 = vector.broadcast %cst_5 : f32 to vector<16x128xf32>
    %8 = arith.maximumf %6, %7 : vector<16x128xf32>
    %9 = arith.truncf %8 : vector<16x128xf32> to vector<16x128xbf16>
    %c0_6 = arith.constant 0 : index
    %c0_7 = arith.constant 0 : index
    %10 = vector.load %arg4[%c0_6, %c0_7] : memref<128x4xbf16, #tpu.memory_space<vmem>>, vector<128x4xbf16>
    %cst_8 = arith.constant dense<0.000000e+00> : vector<16x4xf32>
    %11 = tpu.matmul %9, %10, %cst_8 {dimension_numbers = #tpu.dot_dimension_numbers<[1], [0], [0], [1], [0, 0, 1, 1], [], []>} : vector<16x128xbf16>, vector<128x4xbf16>, vector<16x4xf32> -> vector<16x4xf32>
    %c0_9 = arith.constant 0 : index
    %c0_10 = arith.constant 0 : index
    %12 = vector.load %arg5[%c0_9, %c0_10] : memref<1x4xf32, #tpu.memory_space<vmem>>, vector<1x4xf32>
    %13 = vector.broadcast %12 : vector<1x4xf32> to vector<16x4xf32>
    %14 = arith.addf %11, %13 : vector<16x4xf32>
    %c0_11 = arith.constant 0 : index
    %c0_12 = arith.constant 0 : index
    %15 = vector.load %arg6[%c0_11, %c0_12] : memref<16x4xf32, #tpu.memory_space<vmem>>, vector<16x4xf32>
    tpu.vector_store %arg6[%c0_11, %c0_12], %14 {strides = array<i32>} : memref<16x4xf32, #tpu.memory_space<vmem>>, vector<16x4xf32>,
    return
  }
  func.func @transform_0(%arg0: i32) -> (i32, i32) {
    %c0_i32 = arith.constant 0 : i32
    %c0_i32_0 = arith.constant 0 : i32
    return %arg0, %c0_i32 : i32, i32
  }
  func.func @transform_1(%arg0: i32) -> (i32, i32) {
    %c0_i32 = arith.constant 0 : i32
    %c0_i32_0 = arith.constant 0 : i32
    %c0_i32_1 = arith.constant 0 : i32
    return %c0_i32, %c0_i32_0 : i32, i32
  }
  func.func @transform_2(%arg0: i32) -> (i32, i32) {
    %c0_i32 = arith.constant 0 : i32
    %c0_i32_0 = arith.constant 0 : i32
    %c0_i32_1 = arith.constant 0 : i32
    return %c0_i32, %c0_i32_0 : i32, i32
  }
  func.func @transform_3(%arg0: i32) -> (i32, i32) {
    %c0_i32 = arith.constant 0 : i32
    %c0_i32_0 = arith.constant 0 : i32
    %c0_i32_1 = arith.constant 0 : i32
    return %c0_i32, %c0_i32_0 : i32, i32
  }
  func.func @transform_4(%arg0: i32) -> (i32, i32) {
    %c0_i32 = arith.constant 0 : i32
    %c0_i32_0 = arith.constant 0 : i32
    %c0_i32_1 = arith.constant 0 : i32
    return %c0_i32, %c0_i32_0 : i32, i32
  }
  func.func @transform_5(%arg0: i32) -> (i32, i32) {
    %c0_i32 = arith.constant 0 : i32
    %c0_i32_0 = arith.constant 0 : i32
    return %arg0, %c0_i32 : i32, i32
  }
}

module attributes {stable_mosaic.version = 11 : i64} {
  func.func @_mlp_kernel(%arg0: i32, %arg1: memref<16x8xf32, #tpu.memory_space<vmem>>, %arg2: memref<8x128xbf16, #tpu.memory_space<vmem>>, %arg3: memref<1x128xf32, #tpu.memory_space<vmem>>, %arg4: memref<128x4xbf16, #tpu.memory_space<vmem>>, %arg5: memref<1x4xf32, #tpu.memory_space<vmem>>, %arg6: memref<16x4xf32, #tpu.memory_space<vmem>>) attributes {dimension_semantics = [#tpu.dimension_semantics<arbitrary>], iteration_bounds = array<i64: 1>, scalar_prefetch = 0 : i64, scratch_operands = 0 : i64, tpu.core_type = #tpu.core_type<tc>, window_params = [{transform_indices = @transform_0, window_bounds = array<i64: 16, 8>}, {pipeline_mode = #tpu.pipeline_mode<synchronous>, transform_indices = @transform_1, window_bounds = array<i64: 8, 128>}, {pipeline_mode = #tpu.pipeline_mode<synchronous>, transform_indices = @transform_2, window_bounds = array<i64: 1, 128>}, {pipeline_mode = #tpu.pipeline_mode<synchronous>, transform_indices = @transform_3, window_bounds = array<i64: 128, 4>}, {pipeline_mode = #tpu.pipeline_mode<synchronous>, transform_indices = @transform_4, window_bounds = array<i64: 1, 4>}, {transform_indices = @transform_5, window_bounds = array<i64: 16, 4>}]} {
    %c0 = arith.constant 0 : index
    %c0_0 = arith.constant 0 : index
    %0 = vector.load %arg1[%c0, %c0_0] : memref<16x8xf32, #tpu.memory_space<vmem>>, vector<16x8xf32>
    %1 = arith.truncf %0 : vector<16x8xf32> to vector<16x8xbf16>
    %c0_1 = arith.constant 0 : index
    %c0_2 = arith.constant 0 : index
    %2 = vector.load %arg2[%c0_1, %c0_2] : memref<8x128xbf16, #tpu.memory_space<vmem>>, vector<8x128xbf16>
    %cst = arith.constant dense<0.000000e+00> : vector<16x128xf32>
    %3 = tpu.matmul %1, %2, %cst {dimension_numbers = #tpu.dot_dimension_numbers<[1], [0], [0], [1], [0, 0, 1, 1], [], []>} : vector<16x8xbf16>, vector<8x128xbf16>, vector<16x128xf32> -> vector<16x128xf32>
    %c0_3 = arith.constant 0 : index
    %c0_4 = arith.constant 0 : index
    %4 = vector.load %arg3[%c0_3, %c0_4] : memref<1x128xf32, #tpu.memory_space<vmem>>, vector<1x128xf32>
    %5 = vector.broadcast %4 : vector<1x128xf32> to vector<16x128xf32>
    %6 = arith.addf %3, %5 : vector<16x128xf32>
    %cst_5 = arith.constant 0.000000e+00 : f32
    %7 = vector.broadcast %cst_5 : f32 to vector<16x128xf32>
    %8 = arith.maximumf %6, %7 : vector<16x128xf32>
    %9 = arith.truncf %8 : vector<16x128xf32> to vector<16x128xbf16>
    %c0_6 = arith.constant 0 : index
    %c0_7 = arith.constant 0 : index
    %10 = vector.load %arg4[%c0_6, %c0_7] : memref<128x4xbf16, #tpu.memory_space<vmem>>, vector<128x4xbf16>
    %cst_8 = arith.constant dense<0.000000e+00> : vector<16x4xf32>
    %11 = tpu.matmul %9, %10, %cst_8 {dimension_numbers = #tpu.dot_dimension_numbers<[1], [0], [0], [1], [0, 0, 1, 1], [], []>} : vector<16x128xbf16>, vector<128x4xbf16>, vector<16x4xf32> -> vector<16x4xf32>
    %c0_9 = arith.constant 0 : index
    %c0_10 = arith.constant 0 : index
    %12 = vector.load %arg5[%c0_9, %c0_10] : memref<1x4xf32, #tpu.memory_space<vmem>>, vector<1x4xf32>
    %13 = vector.broadcast %12 : vector<1x4xf32> to vector<16x4xf32>
    %14 = arith.addf %11, %13 : vector<16x4xf32>
    %c0_11 = arith.constant 0 : index
    %c0_12 = arith.constant 0 : index
    %15 = vector.load %arg6[%c0_11, %c0_12] : memref<16x4xf32, #tpu.memory_space<vmem>>, vector<16x4xf32>
    tpu.vector_store %arg6[%c0_11, %c0_12], %14 {strides = array<i32>} : memref<16x4xf32, #tpu.memory_space<vmem>>, vector<16x4xf32>,
    return
  }
  func.func @transform_0(%arg0: i32) -> (i32, i32) {
    %c0_i32 = arith.constant 0 : i32
    %c0_i32_0 = arith.constant 0 : i32
    return %arg0, %c0_i32 : i32, i32
  }
  func.func @transform_1(%arg0: i32) -> (i32, i32) {
    %c0_i32 = arith.constant 0 : i32
    %c0_i32_0 = arith.constant 0 : i32
    %c0_i32_1 = arith.constant 0 : i32
    return %c0_i32, %c0_i32_0 : i32, i32
  }
  func.func @transform_2(%arg0: i32) -> (i32, i32) {
    %c0_i32 = arith.constant 0 : i32
    %c0_i32_0 = arith.constant 0 : i32
    %c0_i32_1 = arith.constant 0 : i32
    return %c0_i32, %c0_i32_0 : i32, i32
  }
  func.func @transform_3(%arg0: i32) -> (i32, i32) {
    %c0_i32 = arith.constant 0 : i32
    %c0_i32_0 = arith.constant 0 : i32
    %c0_i32_1 = arith.constant 0 : i32
    return %c0_i32, %c0_i32_0 : i32, i32
  }
  func.func @transform_4(%arg0: i32) -> (i32, i32) {
    %c0_i32 = arith.constant 0 : i32
    %c0_i32_0 = arith.constant 0 : i32
    %c0_i32_1 = arith.constant 0 : i32
    return %c0_i32, %c0_i32_0 : i32, i32
  }
  func.func @transform_5(%arg0: i32) -> (i32, i32) {
    %c0_i32 = arith.constant 0 : i32
    %c0_i32_0 = arith.constant 0 : i32
    return %arg0, %c0_i32 : i32, i32
  }
}

</mosaic_0001>

<bundles_post_ra>
// kernel: tpu_custom_call.1
= control target key start
LH: loop header
LB: loop body
LE: loop exit
PB: predicated region body
PF: predicated region fallthrough
CT: control target
= control target key end

     0   :  { %vm36_vm0 = vcmask 1043456   ;;  %v261_v0 = vmov 0.0   ;;  %vm262_vm1 = vmmov 0   ;;  %vm32_vm2 = vcmask 64512   ;;  %s338_s1 = inlined_call_operand.vmem [shape: bf16[8,128], index: 1, kind: input, shape index: {}]   ;;  %s339_s0 = inlined_call_operand.vmem [shape: f32[16,8], index: 0, kind: input, shape index: {}]   ;;  %s340_s3 = inlined_call_operand.vmem [shape: bf16[128,4], index: 3, kind: input, shape index: {}]   ;;  %s341_s2 = inlined_call_operand.vmem [shape: f32[1,128], index: 2, kind: input, shape index: {}]   ;;  %s342_s4 = inlined_call_operand.vmem [shape: f32[1,4], index: 4, kind: input, shape index: {}]   ;;  %s343_s5 = inlined_call_operand.vmem [shape: f32[16,4], index: 5, kind: output, shape index: {}]  }
   0x1   :  { %225 = vmatprep.subr.bf16.mxu0 %v261_v0  ;;  %v24_v1 = vld [vmem:[%s338_s1] sm:$0xf]  ;;  %227 = vmatprep.mubr.msk.bf16.mxu0 %vm262_vm1, %v261_v0  ;;  %v22_v3 = vld [vmem:[%s339_s0 + $0x8] sm:$0xff]  ;;  %v253_v6 = vld [vmem:[%s340_s3 + $0x38] sm:$0xff]   ;;  %vm196_vm3 = vcmask 31744  }
   0x2   :  { %v21_v2 = vld [vmem:[%s339_s0] sm:$0xff]  ;;  %v38_v4 = vsel %vm36_vm0, %v24_v1, 0  ;;  %231 = vmatprep.subr.bf16.mxu1 %v261_v0  ;;  %247 = vmatprep.mubr.msk.bf16.mxu1 %vm262_vm1, %v261_v0  ;;  %v254_v7 = vld [vmem:[%s340_s3 + $0x30] sm:$0xff]   ;;  %v255_v8 = vld [vmem:[%s340_s3 + $0x28] sm:$0xff]  }
   0x3   :  { %v23_v5 = vpack.c.bf16 %v22_v3, %v21_v2  ;;  %226 = vmatpush3.bf16.msra.mxu0 %v38_v4  ;;  %232 = vmatpush3.bf16.msra.mxu1 %v253_v6  ;;  %v256_v9 = vld [vmem:[%s340_s3 + $0x20] sm:$0xff]   ;;  %v257_v10 = vld [vmem:[%s340_s3 + $0x18] sm:$0xff]   ;;  %v258_v11 = vld [vmem:[%s340_s3 + $0x10] sm:$0xff]  }
   0x4   :  { %233 = vmatprep.subr.bf16.mxu1 %v261_v0  ;;  %v259_v12 = vld [vmem:[%s340_s3 + $0x8] sm:$0xff]   ;;  %v260_v13 = vld [vmem:[%s340_s3] sm:$0xff]  }
   0x5   :  { %v203_v14 = vld [vmem:[%s341_s2] ss:$0 sm:$0xff] }
   0x6   :  { %228 = vmatmul.mubr.msk.bf16.vlgmr.msra.gmra.mxu0 %vm32_vm2, %v23_v5  ;;  %v205_v24 = vld [vmem:[%s342_s4] ss:$0 sm:$0xff] }
   0x7   :  { %234 = vmatpush3.bf16.msra.mxu1 %v254_v7 }
   0x8   :  { %235 = vmatprep.subr.bf16.mxu1 %v261_v0 }
   0xb   :  { %236 = vmatpush3.bf16.msra.mxu1 %v255_v8 }
   0xc   :  { %237 = vmatprep.subr.bf16.mxu1 %v261_v0 }
   0xf   :  { %238 = vmatpush3.bf16.msra.mxu1 %v256_v9 }
  0x10   :  { %239 = vmatprep.subr.bf16.mxu1 %v261_v0 }
  0x13   :  { %240 = vmatpush3.bf16.msra.mxu1 %v257_v10 }
  0x14   :  { %241 = vmatprep.subr.bf16.mxu1 %v261_v0 }
  0x17   :  { %242 = vmatpush3.bf16.msra.mxu1 %v258_v11 }
  0x18   :  { %243 = vmatprep.subr.bf16.mxu1 %v261_v0 }
  0x1b   :  { %244 = vmatpush3.bf16.msra.mxu1 %v259_v12 }
  0x1c   :  { %245 = vmatprep.subr.bf16.mxu1 %v261_v0 }
  0x1f   :  { %246 = vmatpush3.bf16.msra.mxu1 %v260_v13 }
  0xc6   :  { %v74_v15 = vpop.f32.mrf.mxu0 }
  0xc7   :  { %v75_v17 = vadd.f32 %v203_v14, %v74_v15 }
  0xc8   :  { %v229_v16 = vpop.f32.mrf.mxu0 }
  0xc9   :  { %v81_v21 = vmax.f32 %v75_v17, 0.0 }
  0xca   :  { %v77_v18 = vpop.f32.mrf.mxu0 }
  0xcb   :  { %v78_v19 = vadd.f32 %v203_v14, %v77_v18 }
  0xcc   :  { %v230_v20 = vpop.f32.mrf.mxu0 }
  0xcd   :  { %v82_v22 = vmax.f32 %v78_v19, 0.0 }
  0xcf   :  { %v83_v23 = vpack.c.bf16 %v82_v22, %v81_v21 }
  0xd1   :  { %248 = vmatmul.mubr.bf16.vlgmr.msra.gmra.mxu1 %v83_v23 }
 0x191   :  { %v189_v25 = vpop.f32.mrf.mxu1 }
 0x192   :  { %v190_v26 = vadd.f32 %v205_v24, %v189_v25 }
 0x193   :  { %v249_v27 = vpop.f32.mrf.mxu1 }
 0x194   :  { %197 = vst.msk [vmem:[%s343_s5] sm:$0xff] %vm196_vm3, %v190_v26 }
 0x195   :  { %v192_v28 = vpop.f32.mrf.mxu1 }
 0x196   :  { %v193_v29 = vadd.f32 %v205_v24, %v192_v28 }
 0x197   :  { %v250_v30 = vpop.f32.mrf.mxu1 }
 0x198   :  { %198 = vst.msk [vmem:[%s343_s5 + $0x8] sm:$0xff] %vm196_vm3, %v193_v29 }

// kernel: tpu_custom_call.1
= control target key start
LH: loop header
LB: loop body
LE: loop exit
PB: predicated region body
PF: predicated region fallthrough
CT: control target
= control target key end

     0   :  { %vm36_vm0 = vcmask 1043456   ;;  %v261_v0 = vmov 0.0   ;;  %vm262_vm1 = vmmov 0   ;;  %vm32_vm2 = vcmask 64512   ;;  %s338_s1 = inlined_call_operand.vmem [shape: bf16[8,128], index: 1, kind: input, shape index: {}]   ;;  %s339_s0 = inlined_call_operand.vmem [shape: f32[16,8], index: 0, kind: input, shape index: {}]   ;;  %s340_s3 = inlined_call_operand.vmem [shape: bf16[128,4], index: 3, kind: input, shape index: {}]   ;;  %s341_s2 = inlined_call_operand.vmem [shape: f32[1,128], index: 2, kind: input, shape index: {}]   ;;  %s342_s4 = inlined_call_operand.vmem [shape: f32[1,4], index: 4, kind: input, shape index: {}]   ;;  %s343_s5 = inlined_call_operand.vmem [shape: f32[16,4], index: 5, kind: output, shape index: {}]  }
   0x1   :  { %225 = vmatprep.subr.bf16.mxu0 %v261_v0  ;;  %v24_v1 = vld [vmem:[%s338_s1] sm:$0xf]  ;;  %227 = vmatprep.mubr.msk.bf16.mxu0 %vm262_vm1, %v261_v0  ;;  %v22_v3 = vld [vmem:[%s339_s0 + $0x8] sm:$0xff]  ;;  %v253_v6 = vld [vmem:[%s340_s3 + $0x38] sm:$0xff]   ;;  %vm196_vm3 = vcmask 31744  }
   0x2   :  { %v21_v2 = vld [vmem:[%s339_s0] sm:$0xff]  ;;  %v38_v4 = vsel %vm36_vm0, %v24_v1, 0  ;;  %231 = vmatprep.subr.bf16.mxu1 %v261_v0  ;;  %247 = vmatprep.mubr.msk.bf16.mxu1 %vm262_vm1, %v261_v0  ;;  %v254_v7 = vld [vmem:[%s340_s3 + $0x30] sm:$0xff]   ;;  %v255_v8 = vld [vmem:[%s340_s3 + $0x28] sm:$0xff]  }
   0x3   :  { %v23_v5 = vpack.c.bf16 %v22_v3, %v21_v2  ;;  %226 = vmatpush3.bf16.msra.mxu0 %v38_v4  ;;  %232 = vmatpush3.bf16.msra.mxu1 %v253_v6  ;;  %v256_v9 = vld [vmem:[%s340_s3 + $0x20] sm:$0xff]   ;;  %v257_v10 = vld [vmem:[%s340_s3 + $0x18] sm:$0xff]   ;;  %v258_v11 = vld [vmem:[%s340_s3 + $0x10] sm:$0xff]  }
   0x4   :  { %233 = vmatprep.subr.bf16.mxu1 %v261_v0  ;;  %v259_v12 = vld [vmem:[%s340_s3 + $0x8] sm:$0xff]   ;;  %v260_v13 = vld [vmem:[%s340_s3] sm:$0xff]  }
   0x5   :  { %v203_v14 = vld [vmem:[%s341_s2] ss:$0 sm:$0xff] }
   0x6   :  { %228 = vmatmul.mubr.msk.bf16.vlgmr.msra.gmra.mxu0 %vm32_vm2, %v23_v5  ;;  %v205_v24 = vld [vmem:[%s342_s4] ss:$0 sm:$0xff] }
   0x7   :  { %234 = vmatpush3.bf16.msra.mxu1 %v254_v7 }
   0x8   :  { %235 = vmatprep.subr.bf16.mxu1 %v261_v0 }
   0xb   :  { %236 = vmatpush3.bf16.msra.mxu1 %v255_v8 }
   0xc   :  { %237 = vmatprep.subr.bf16.mxu1 %v261_v0 }
   0xf   :  { %238 = vmatpush3.bf16.msra.mxu1 %v256_v9 }
  0x10   :  { %239 = vmatprep.subr.bf16.mxu1 %v261_v0 }
  0x13   :  { %240 = vmatpush3.bf16.msra.mxu1 %v257_v10 }
  0x14   :  { %241 = vmatprep.subr.bf16.mxu1 %v261_v0 }
  0x17   :  { %242 = vmatpush3.bf16.msra.mxu1 %v258_v11 }
  0x18   :  { %243 = vmatprep.subr.bf16.mxu1 %v261_v0 }
  0x1b   :  { %244 = vmatpush3.bf16.msra.mxu1 %v259_v12 }
  0x1c   :  { %245 = vmatprep.subr.bf16.mxu1 %v261_v0 }
  0x1f   :  { %246 = vmatpush3.bf16.msra.mxu1 %v260_v13 }
  0xc6   :  { %v74_v15 = vpop.f32.mrf.mxu0 }
  0xc7   :  { %v75_v17 = vadd.f32 %v203_v14, %v74_v15 }
  0xc8   :  { %v229_v16 = vpop.f32.mrf.mxu0 }
  0xc9   :  { %v81_v21 = vmax.f32 %v75_v17, 0.0 }
  0xca   :  { %v77_v18 = vpop.f32.mrf.mxu0 }
  0xcb   :  { %v78_v19 = vadd.f32 %v203_v14, %v77_v18 }
  0xcc   :  { %v230_v20 = vpop.f32.mrf.mxu0 }
  0xcd   :  { %v82_v22 = vmax.f32 %v78_v19, 0.0 }
  0xcf   :  { %v83_v23 = vpack.c.bf16 %v82_v22, %v81_v21 }
  0xd1   :  { %248 = vmatmul.mubr.bf16.vlgmr.msra.gmra.mxu1 %v83_v23 }
 0x191   :  { %v189_v25 = vpop.f32.mrf.mxu1 }
 0x192   :  { %v190_v26 = vadd.f32 %v205_v24, %v189_v25 }
 0x193   :  { %v249_v27 = vpop.f32.mrf.mxu1 }
 0x194   :  { %197 = vst.msk [vmem:[%s343_s5] sm:$0xff] %vm196_vm3, %v190_v26 }
 0x195   :  { %v192_v28 = vpop.f32.mrf.mxu1 }
 0x196   :  { %v193_v29 = vadd.f32 %v205_v24, %v192_v28 }
 0x197   :  { %v250_v30 = vpop.f32.mrf.mxu1 }
 0x198   :  { %198 = vst.msk [vmem:[%s343_s5 + $0x8] sm:$0xff] %vm196_vm3, %v193_v29 }

</bundles_post_ra>
